<compile_context>
chip_gen: v5e
topology: v5e:2x2
jax: 0.10.0
libtpu: 0.0.40
codegen_flags: <defaults>
</compile_context>

<pallas_src>
import math
from functools import partial

import jax
import jax.numpy as jnp
from jax.experimental import pallas as pl
from jax.experimental.pallas import tpu as pltpu

HIDDEN = 250
HIDDEN_PAD = 256      # MXU-tile aligned hidden width
W3_LANES = 128        # lane-dense third-matmul operand width


def _round_up(x, m):
    return ((x + m - 1) // m) * m


def _actor_kernel(x_ref, w1_ref, b1_ref, w2_ref, b2_ref, w3_ref, b3_ref,
                  scale_ref, o_ref):
    # fa1 + relu   (bf16 x bf16 -> f32 accumulation on the MXU)
    x = x_ref[...].astype(jnp.bfloat16)
    h1 = jnp.dot(x, w1_ref[...], preferred_element_type=jnp.float32)
    h1 = jnp.maximum(h1 + b1_ref[...], 0.0).astype(jnp.bfloat16)
    # fa2 + relu
    h2 = jnp.dot(h1, w2_ref[...], preferred_element_type=jnp.float32)
    h2 = jnp.maximum(h2 + b2_ref[...], 0.0).astype(jnp.bfloat16)
    # fa3: lane-dense 128-wide MXU matmul, but only the first out_pad (=8)
    # columns are real; bias / epilogue / store are applied to that slice only.
    a_full = jnp.dot(h2, w3_ref[...], preferred_element_type=jnp.float32)
    out_pad = o_ref.shape[1]
    a = a_full[:, :out_pad] + b3_ref[...]
    # PyTorch epilogue:
    #   action[:, 0] = tanh(action[:, 0]) * action_limit_v
    #   action[:, 1] = tanh(action[:, 1]) * action_limit_w
    # scale_ref holds [limit_v, limit_w, 1, ...]; columns >= 2 pass through.
    col = jax.lax.broadcasted_iota(jnp.int32, a.shape, dimension=1)
    o_ref[...] = jnp.where(col < 2, jnp.tanh(a) * scale_ref[...], a).astype(o_ref.dtype)


def init_actor_params(key, state_dim, action_dim, hidden=HIDDEN):
    """Xavier-uniform weights ([in, out] layout, transposed vs torch) + 0.01 biases."""
    def xavier(k, fan_in, fan_out):
        bound = math.sqrt(6.0 / (fan_in + fan_out))
        return jax.random.uniform(k, (fan_in, fan_out), jnp.float32, -bound, bound)

    k1, k2, k3 = jax.random.split(key, 3)
    w1 = xavier(k1, state_dim, hidden)
    b1 = jnp.full((1, hidden), 0.01, jnp.float32)
    w2 = xavier(k2, hidden, hidden)
    b2 = jnp.full((1, hidden), 0.01, jnp.float32)
    w3 = xavier(k3, hidden, action_dim)
    b3 = jnp.full((1, action_dim), 0.01, jnp.float32)
    return (w1, b1, w2, b2, w3, b3)


def prepare_params(params, action_limit_v, action_limit_w,
                   hidden_pad=HIDDEN_PAD, w3_lanes=W3_LANES):
    """Pad to hardware-friendly shapes, cast weights to bf16 (biases stay f32) and
    build the action-limit scale row once (hoisted out of the per-call path).
    Padded bias entries are 0.0 (NOT 0.01) so padded units stay exactly 0 through
    ReLU."""
    w1, b1, w2, b2, w3, b3 = params
    action_dim = w3.shape[1]
    w3_lanes = max(w3_lanes, _round_up(action_dim, 128))
    out_pad = min(w3_lanes, _round_up(max(action_dim, 2), 8))

    def pad2(a, rows, cols):
        return jnp.pad(a, ((0, rows - a.shape[0]), (0, cols - a.shape[1])))

    w1p = pad2(w1, w1.shape[0], hidden_pad).astype(jnp.bfloat16)
    b1p = pad2(b1, 1, hidden_pad)
    w2p = pad2(w2, hidden_pad, hidden_pad).astype(jnp.bfloat16)
    b2p = pad2(b2, 1, hidden_pad)
    w3p = pad2(w3, hidden_pad, w3_lanes).astype(jnp.bfloat16)
    b3p = pad2(b3, 1, out_pad)
    # Runtime scale row: limits in columns 0/1, 1.0 elsewhere (changing the limits
    # never triggers a Mosaic recompile).
    scale = jnp.ones((1, out_pad), jnp.float32)
    scale = scale.at[0, 0].set(action_limit_v).at[0, 1].set(action_limit_w)
    return (w1p, b1p, w2p, b2p, w3p, b3p, scale), action_dim


@partial(jax.jit, static_argnames=("action_dim", "batch_tile"))
def actor_forward(state, padded_params, action_dim, batch_tile=1024):
    """state: [B, state_dim] (or [state_dim]) f32 -> action: [B, action_dim] (or [action_dim]) f32."""
    w1, b1, w2, b2, w3, b3, scale = padded_params

    squeeze = state.ndim == 1
    if squeeze:                     # non-batched branch of the torch forward
        state = state[None, :]

    B, S = state.shape
    out_pad = scale.shape[1]

    # Batch tile: multiple of 8 sublanes, as large as possible (amortizes the
    # ~0.35 us per-grid-step overhead), but for medium/large batches keep >= 2
    # grid steps so the "parallel" axis can be split across v7x's 2 TensorCores.
    B8 = _round_up(B, 8)
    tb = min(batch_tile, B8)
    if B8 >= 256 and B8 // tb < 2:
        tb = _round_up(B8 // 2, 8)
    tb = max(8, tb)
    B_pad = _round_up(B, tb)
    x = state if B_pad == B else jnp.pad(state, ((0, B_pad - B), (0, 0)))

    H_pad = w1.shape[1]
    flops = 2 * B_pad * (S * H_pad + H_pad * H_pad + H_pad * w3.shape[1])
    bytes_accessed = (
        (w1.size + w2.size + w3.size) * 2                     # bf16 weights
        + (b1.size + b2.size + b3.size + scale.size) * 4      # f32 biases + scale
        + B_pad * S * 4 + B_pad * out_pad * 4                 # activations in/out
    )
    cost = pl.CostEstimate(flops=flops,
                           transcendentals=B_pad * out_pad,
                           bytes_accessed=bytes_accessed)

    out = pl.pallas_call(
        _actor_kernel,
        out_shape=jax.ShapeDtypeStruct((B_pad, out_pad), jnp.float32),
        grid=(B_pad // tb,),
        in_specs=[
            pl.BlockSpec((tb, S), lambda i: (i, 0)),      # state tile, streamed
            pl.BlockSpec(w1.shape, lambda i: (0, 0)),     # weights/biases: constant
            pl.BlockSpec(b1.shape, lambda i: (0, 0)),     #   block index -> stay
            pl.BlockSpec(w2.shape, lambda i: (0, 0)),     #   resident in VMEM
            pl.BlockSpec(b2.shape, lambda i: (0, 0)),
            pl.BlockSpec(w3.shape, lambda i: (0, 0)),
            pl.BlockSpec(b3.shape, lambda i: (0, 0)),
            pl.BlockSpec(scale.shape, lambda i: (0, 0)),
        ],
        out_specs=pl.BlockSpec((tb, out_pad), lambda i: (i, 0)),
        compiler_params=pltpu.CompilerParams(
            dimension_semantics=("parallel",)),           # both TCs on v7x
        cost_estimate=cost,
    )(x, w1, b1, w2, b2, w3, b3, scale)

    out = out[:B, :action_dim]
    return out[0] if squeeze else out


if __name__ == "__main__":
    state_dim = 16
    action_dim = 2
    batch = 8
    action_limit_v = 0.22
    action_limit_w = 2.0

    key = jax.random.PRNGKey(0)
    k_params, k_state = jax.random.split(key)
    raw_params = init_actor_params(k_params, state_dim, action_dim)
    padded_params, adim = prepare_params(raw_params, action_limit_v, action_limit_w)
    state = jax.random.normal(k_state, (batch, state_dim), jnp.float32)

    action = actor_forward(state, padded_params, adim)
    action = jax.block_until_ready(action)
    assert action.shape == (batch, action_dim)

    # Reference 1: replicate the kernel's bf16-weight/activation numerics (tight check).
    w1, b1, w2, b2, w3, b3 = raw_params
    bf = jnp.bfloat16
    h1 = jnp.maximum(jnp.dot(state.astype(bf), w1.astype(bf),
                             preferred_element_type=jnp.float32) + b1, 0.0).astype(bf)
    h2 = jnp.maximum(jnp.dot(h1, w2.astype(bf),
                             preferred_element_type=jnp.float32) + b2, 0.0).astype(bf)
    a_bf = jnp.dot(h2, w3.astype(bf), preferred_element_type=jnp.float32) + b3
    ref_bf = a_bf.at[:, 0].set(jnp.tanh(a_bf[:, 0]) * action_limit_v)
    ref_bf = ref_bf.at[:, 1].set(jnp.tanh(a_bf[:, 1]) * action_limit_w)
    assert jnp.allclose(action, ref_bf, atol=1e-3, rtol=1e-3), "mismatch vs bf16 reference"

    # Reference 2: full f32 reference (loose sanity check on bf16 weight quantization).
    h1f = jnp.maximum(state @ w1 + b1, 0.0)
    h2f = jnp.maximum(h1f @ w2 + b2, 0.0)
    af = h2f @ w3 + b3
    ref_f32 = af.at[:, 0].set(jnp.tanh(af[:, 0]) * action_limit_v)
    ref_f32 = ref_f32.at[:, 1].set(jnp.tanh(af[:, 1]) * action_limit_w)
    assert jnp.allclose(action, ref_f32, atol=1e-1, rtol=1e-1), "mismatch vs f32 reference"

    # Non-batched (1-D state) branch of the torch forward.
    a1 = actor_forward(state[0], padded_params, adim)
    a1 = jax.block_until_ready(a1)
    assert a1.shape == (action_dim,)
    assert jnp.allclose(a1, action[0], atol=1e-5, rtol=1e-5)

    # Larger batch: exercises the multi-step grid path (>= 2 grid steps for v7x).
    big_state = jax.random.normal(k_state, (300, state_dim), jnp.float32)
    big = jax.block_until_ready(actor_forward(big_state, padded_params, adim))
    assert big.shape == (300, action_dim)
    h1b = jnp.maximum(big_state @ w1 + b1, 0.0)
    h2b = jnp.maximum(h1b @ w2 + b2, 0.0)
    ab = h2b @ w3 + b3
    ref_big = ab.at[:, 0].set(jnp.tanh(ab[:, 0]) * action_limit_v)
    ref_big = ref_big.at[:, 1].set(jnp.tanh(ab[:, 1]) * action_limit_w)
    assert jnp.allclose(big, ref_big, atol=1e-1, rtol=1e-1), "mismatch on tiled batch"

    print("KERNEL_OK")
</pallas_src>

<mosaic_0001>
module attributes {stable_mosaic.version = 11 : i64} {
  func.func @_actor_kernel(%arg0: i32, %arg1: memref<8x16xf32, #tpu.memory_space<vmem>>, %arg2: memref<16x256xbf16, #tpu.memory_space<vmem>>, %arg3: memref<1x256xf32, #tpu.memory_space<vmem>>, %arg4: memref<256x256xbf16, #tpu.memory_space<vmem>>, %arg5: memref<1x256xf32, #tpu.memory_space<vmem>>, %arg6: memref<256x128xbf16, #tpu.memory_space<vmem>>, %arg7: memref<1x8xf32, #tpu.memory_space<vmem>>, %arg8: memref<1x8xf32, #tpu.memory_space<vmem>>, %arg9: memref<8x8xf32, #tpu.memory_space<vmem>>) attributes {dimension_semantics = [#tpu.dimension_semantics<parallel>], iteration_bounds = array<i64: 1>, scalar_prefetch = 0 : i64, scratch_operands = 0 : i64, tpu.core_type = #tpu.core_type<tc>, window_params = [{transform_indices = @transform_0, window_bounds = array<i64: 8, 16>}, {pipeline_mode = #tpu.pipeline_mode<synchronous>, transform_indices = @transform_1, window_bounds = array<i64: 16, 256>}, {pipeline_mode = #tpu.pipeline_mode<synchronous>, transform_indices = @transform_2, window_bounds = array<i64: 1, 256>}, {pipeline_mode = #tpu.pipeline_mode<synchronous>, transform_indices = @transform_3, window_bounds = array<i64: 256, 256>}, {pipeline_mode = #tpu.pipeline_mode<synchronous>, transform_indices = @transform_4, window_bounds = array<i64: 1, 256>}, {pipeline_mode = #tpu.pipeline_mode<synchronous>, transform_indices = @transform_5, window_bounds = array<i64: 256, 128>}, {pipeline_mode = #tpu.pipeline_mode<synchronous>, transform_indices = @transform_6, window_bounds = array<i64: 1, 8>}, {pipeline_mode = #tpu.pipeline_mode<synchronous>, transform_indices = @transform_7, window_bounds = array<i64: 1, 8>}, {transform_indices = @transform_8, window_bounds = array<i64: 8, 8>}]} {
    %c0 = arith.constant 0 : index
    %c0_0 = arith.constant 0 : index
    %0 = vector.load %arg1[%c0, %c0_0] : memref<8x16xf32, #tpu.memory_space<vmem>>, vector<8x16xf32>
    %1 = arith.truncf %0 : vector<8x16xf32> to vector<8x16xbf16>
    %c0_1 = arith.constant 0 : index
    %c0_2 = arith.constant 0 : index
    %2 = vector.load %arg2[%c0_1, %c0_2] : memref<16x256xbf16, #tpu.memory_space<vmem>>, vector<16x256xbf16>
    %cst = arith.constant dense<0.000000e+00> : vector<8x256xf32>
    %3 = tpu.matmul %1, %2, %cst {dimension_numbers = #tpu.dot_dimension_numbers<[1], [0], [0], [1], [0, 0, 1, 1], [], []>} : vector<8x16xbf16>, vector<16x256xbf16>, vector<8x256xf32> -> vector<8x256xf32>
    %c0_3 = arith.constant 0 : index
    %c0_4 = arith.constant 0 : index
    %4 = vector.load %arg3[%c0_3, %c0_4] : memref<1x256xf32, #tpu.memory_space<vmem>>, vector<1x256xf32>
    %5 = vector.broadcast %4 : vector<1x256xf32> to vector<8x256xf32>
    %6 = arith.addf %3, %5 : vector<8x256xf32>
    %cst_5 = arith.constant 0.000000e+00 : f32
    %7 = vector.broadcast %cst_5 : f32 to vector<8x256xf32>
    %8 = arith.maximumf %6, %7 : vector<8x256xf32>
    %9 = arith.truncf %8 : vector<8x256xf32> to vector<8x256xbf16>
    %c0_6 = arith.constant 0 : index
    %c0_7 = arith.constant 0 : index
    %10 = vector.load %arg4[%c0_6, %c0_7] : memref<256x256xbf16, #tpu.memory_space<vmem>>, vector<256x256xbf16>
    %cst_8 = arith.constant dense<0.000000e+00> : vector<8x256xf32>
    %11 = tpu.matmul %9, %10, %cst_8 {dimension_numbers = #tpu.dot_dimension_numbers<[1], [0], [0], [1], [0, 0, 1, 1], [], []>} : vector<8x256xbf16>, vector<256x256xbf16>, vector<8x256xf32> -> vector<8x256xf32>
    %c0_9 = arith.constant 0 : index
    %c0_10 = arith.constant 0 : index
    %12 = vector.load %arg5[%c0_9, %c0_10] : memref<1x256xf32, #tpu.memory_space<vmem>>, vector<1x256xf32>
    %13 = vector.broadcast %12 : vector<1x256xf32> to vector<8x256xf32>
    %14 = arith.addf %11, %13 : vector<8x256xf32>
    %cst_11 = arith.constant 0.000000e+00 : f32
    %15 = vector.broadcast %cst_11 : f32 to vector<8x256xf32>
    %16 = arith.maximumf %14, %15 : vector<8x256xf32>
    %17 = arith.truncf %16 : vector<8x256xf32> to vector<8x256xbf16>
    %c0_12 = arith.constant 0 : index
    %c0_13 = arith.constant 0 : index
    %18 = vector.load %arg6[%c0_12, %c0_13] : memref<256x128xbf16, #tpu.memory_space<vmem>>, vector<256x128xbf16>
    %cst_14 = arith.constant dense<0.000000e+00> : vector<8x128xf32>
    %19 = tpu.matmul %17, %18, %cst_14 {dimension_numbers = #tpu.dot_dimension_numbers<[1], [0], [0], [1], [0, 0, 1, 1], [], []>} : vector<8x256xbf16>, vector<256x128xbf16>, vector<8x128xf32> -> vector<8x128xf32>
    %20 = vector.extract_strided_slice %19 {offsets = [0, 0], sizes = [8, 8], strides = [1, 1]} : vector<8x128xf32> to vector<8x8xf32>
    %c0_15 = arith.constant 0 : index
    %c0_16 = arith.constant 0 : index
    %21 = vector.load %arg7[%c0_15, %c0_16] : memref<1x8xf32, #tpu.memory_space<vmem>>, vector<1x8xf32>
    %22 = vector.broadcast %21 : vector<1x8xf32> to vector<8x8xf32>
    %23 = arith.addf %20, %22 : vector<8x8xf32>
    %24 = tpu.iota {dimensions = array<i32: 1>} : vector<8x8xi32>
    %c2_i32 = arith.constant 2 : i32
    %25 = vector.broadcast %c2_i32 : i32 to vector<8x8xi32>
    %26 = arith.cmpi slt, %24, %25 : vector<8x8xi32>
    %27 = math.tanh %23 : vector<8x8xf32>
    %c0_17 = arith.constant 0 : index
    %c0_18 = arith.constant 0 : index
    %28 = vector.load %arg8[%c0_17, %c0_18] : memref<1x8xf32, #tpu.memory_space<vmem>>, vector<1x8xf32>
    %29 = vector.broadcast %28 : vector<1x8xf32> to vector<8x8xf32>
    %30 = arith.mulf %27, %29 : vector<8x8xf32>
    %31 = arith.select %26, %30, %23 : vector<8x8xi1>, vector<8x8xf32>
    %c0_19 = arith.constant 0 : index
    %c0_20 = arith.constant 0 : index
    %32 = vector.load %arg9[%c0_19, %c0_20] : memref<8x8xf32, #tpu.memory_space<vmem>>, vector<8x8xf32>
    tpu.vector_store %arg9[%c0_19, %c0_20], %31 {strides = array<i32>} : memref<8x8xf32, #tpu.memory_space<vmem>>, vector<8x8xf32>,
    return
  }
  func.func @transform_0(%arg0: i32) -> (i32, i32) {
    %c0_i32 = arith.constant 0 : i32
    %c0_i32_0 = arith.constant 0 : i32
    return %arg0, %c0_i32 : i32, i32
  }
  func.func @transform_1(%arg0: i32) -> (i32, i32) {
    %c0_i32 = arith.constant 0 : i32
    %c0_i32_0 = arith.constant 0 : i32
    %c0_i32_1 = arith.constant 0 : i32
    return %c0_i32, %c0_i32_0 : i32, i32
  }
  func.func @transform_2(%arg0: i32) -> (i32, i32) {
    %c0_i32 = arith.constant 0 : i32
    %c0_i32_0 = arith.constant 0 : i32
    %c0_i32_1 = arith.constant 0 : i32
    return %c0_i32, %c0_i32_0 : i32, i32
  }
  func.func @transform_3(%arg0: i32) -> (i32, i32) {
    %c0_i32 = arith.constant 0 : i32
    %c0_i32_0 = arith.constant 0 : i32
    %c0_i32_1 = arith.constant 0 : i32
    return %c0_i32, %c0_i32_0 : i32, i32
  }
  func.func @transform_4(%arg0: i32) -> (i32, i32) {
    %c0_i32 = arith.constant 0 : i32
    %c0_i32_0 = arith.constant 0 : i32
    %c0_i32_1 = arith.constant 0 : i32
    return %c0_i32, %c0_i32_0 : i32, i32
  }
  func.func @transform_5(%arg0: i32) -> (i32, i32) {
    %c0_i32 = arith.constant 0 : i32
    %c0_i32_0 = arith.constant 0 : i32
    %c0_i32_1 = arith.constant 0 : i32
    return %c0_i32, %c0_i32_0 : i32, i32
  }
  func.func @transform_6(%arg0: i32) -> (i32, i32) {
    %c0_i32 = arith.constant 0 : i32
    %c0_i32_0 = arith.constant 0 : i32
    %c0_i32_1 = arith.constant 0 : i32
    return %c0_i32, %c0_i32_0 : i32, i32
  }
  func.func @transform_7(%arg0: i32) -> (i32, i32) {
    %c0_i32 = arith.constant 0 : i32
    %c0_i32_0 = arith.constant 0 : i32
    %c0_i32_1 = arith.constant 0 : i32
    return %c0_i32, %c0_i32_0 : i32, i32
  }
  func.func @transform_8(%arg0: i32) -> (i32, i32) {
    %c0_i32 = arith.constant 0 : i32
    %c0_i32_0 = arith.constant 0 : i32
    return %arg0, %c0_i32 : i32, i32
  }
}

</mosaic_0001>

<bundles_post_ra>
// kernel: actor_forward.1
= control target key start
LH: loop header
LB: loop body
LE: loop exit
PB: predicated region body
PF: predicated region fallthrough
CT: control target
= control target key end

     0   :  { %13 = vsyncpa [#allocation3], 0  ;;  %s1064_s0 = inlined_call_operand.hbm [shape: f32[8,16], index: 0, kind: input, shape index: {}]   ;;  %s1065_s1 = inlined_call_operand.hbm [shape: bf16[16,256], index: 1, kind: input, shape index: {}]   ;;  %s1066_s2 = inlined_call_operand.hbm [shape: f32[1,256], index: 2, kind: input, shape index: {}]   ;;  %s1067_s3 = inlined_call_operand.hbm [shape: bf16[256,256], index: 3, kind: input, shape index: {}]   ;;  %s1068_s4 = inlined_call_operand.vmem [shape: f32[1,256], index: 4, kind: input, shape index: {}]   ;;  %s1069_s5 = inlined_call_operand.hbm [shape: bf16[256,128], index: 5, kind: input, shape index: {}]   ;;  %s1070_s6 = inlined_call_operand.vmem [shape: f32[1,8], index: 6, kind: input, shape index: {}]   ;;  %s1071_s7 = inlined_call_operand.vmem [shape: f32[1,8], index: 7, kind: input, shape index: {}]   ;;  %s1072_s8 = inlined_call_operand.vmem [shape: f32[8,8], index: 8, kind: output, shape index: {}]  }
   0x1   :  { %14 = vsyncpa [#allocation5], 0  ;;  %s31_s29 = sshll.u32 %s1065_s1, 4  ;;  %s32_s29 = int_to_ptr.hbm [resolvable:$true] %s31_s29 }
   0x2   :  { %15 = vsyncpa [#allocation8], 0  ;;  %s981_s30 = smov [#allocation4]   ;;  %s55_s12 = sshll.u32 %s1067_s3, 4  ;;  %s56_s12 = int_to_ptr.hbm [resolvable:$true] %s55_s12 }
   0x3   :  { %s33_s9 = sshll.u32 %s981_s30, 4  ;;  %s982_s13 = smov 128   ;;  %s34_s9 = int_to_ptr.vmem [resolvable:$true] %s33_s9 }
   0x4   :  { %s983_s14 = smov 8   ;;  %s984_s15 = smov [#allocation7]  }
   0x5   :  { %39 = dma.hbm_to_vmem [thread:$0]  %s32_s29, 256, %s34_s9, [#allocation5], %s982_s13, %s982_s13, %s983_s14  }
   0x6   :  { %s57_s16 = sshll.u32 %s984_s15, 4  ;;  %s21_s19 = sshll.u32 %s1064_s0, 4  ;;  %s58_s16 = int_to_ptr.vmem [resolvable:$true] %s57_s16  ;;  %s22_s19 = int_to_ptr.hbm [resolvable:$true] %s21_s19 }
   0x7   :  { %63 = dma.hbm_to_vmem [thread:$0]  %s56_s12, 4096, %s58_s16, [#allocation8], %s982_s13, %s982_s13, %s983_s14  }
   0x8   :  { %s45_s21 = sshll.u32 %s1066_s2, 4  ;;  %s985_s22 = smov [#allocation2]   ;;  %s46_s21 = int_to_ptr.hbm [resolvable:$true] %s45_s21 }
   0x9   :  { %s23_s23 = sshll.u32 %s985_s22, 4  ;;  %s986_s3 = smov [#allocation6]   ;;  %s24_s23 = int_to_ptr.vmem [resolvable:$true] %s23_s23 }
   0xa   :  { %26 = dma.hbm_to_vmem [thread:$0]  %s22_s19, 128, %s24_s23, [#allocation3]  }
   0xb   :  { %s47_s24 = sshll.u32 %s986_s3, 4  ;;  %s70_s27 = sshll.u32 %s1069_s5, 4  ;;  %s48_s24 = int_to_ptr.vmem [resolvable:$true] %s47_s24  ;;  %s71_s27 = int_to_ptr.hbm [resolvable:$true] %s70_s27 }
   0xc   :  { %50 = dma.hbm_to_vmem [thread:$0]  %s46_s21, 32, %s48_s24, [#allocation5]  }
   0xd   :  { %s987_s0 = smov [#allocation9]   ;;  %s988_s29 = smov 64  }
   0xe   :  { %s72_s28 = sshll.u32 %s987_s0, 4  ;;  %s989_s30 = smov 4   ;;  %s73_s28 = int_to_ptr.vmem [resolvable:$true] %s72_s28 }
   0xf   :  { %78 = dma.hbm_to_vmem [thread:$0]  %s71_s27, 2048, %s73_s28, [#allocation8], %s988_s29, %s988_s29, %s989_s30  }
  0x10   :  { %975 = dma.done.wait [#allocation3], 128  }
  0x11   :  { %976 = vsyncadd [#allocation3], 4294967168 }
  0x12   :  { %977 = dma.done.wait [#allocation5], 288  }
  0x13   :  { %978 = vsyncadd [#allocation5], 4294967008 }
  0x14   :  { %979 = dma.done.wait [#allocation8], 6144  }
  0x15   :  { %980 = vsyncadd [#allocation8], 4294961152  ;;  %v592_v0 = vld [vmem:[#allocation4] sm:$0xf]  ;;  %v793_v1 = vld [vmem:[#allocation4 + $0x4] sm:$0xf0] }
  0x16   :  { %v792_v2 = vld [vmem:[#allocation4 + $0x4] sm:$0xf]  ;;  %v593_v3 = vor.u32 %v793_v1, %v592_v0  ;;  %v594_v4 = vld [vmem:[#allocation4 + $0x8] sm:$0xf0]  ;;  %v104_v5 = vld [vmem:[#allocation2] sm:$0xff]  ;;  %vm124_vm0 = vcmask 130048  }
  0x17   :  { %v658_v6 = vld [vmem:[#allocation7 + $0x70] sm:$0xf]  ;;  %v597_v7 = vor.u32 %v792_v2, %v594_v4  ;;  %v105_v8 = vpack.c.bf16 %v104_v5, %v104_v5  ;;  %v809_v9 = vld [vmem:[#allocation7 + $0x74] sm:$0xf0]  ;;  %v808_v14 = vld [vmem:[#allocation7 + $0x74] sm:$0xf] }
  0x18   :  { %v722_v10 = vld [vmem:[#allocation7 + $0xf0] sm:$0xf]  ;;  %v825_v11 = vld [vmem:[#allocation7 + $0xf4] sm:$0xf0]  ;;  %135 = vmatpush.bf16.msra.mxu0 %v593_v3  ;;  %v659_v12 = vor.u32 %v809_v9, %v658_v6  ;;  %v660_v15 = vld [vmem:[#allocation7 + $0x78] sm:$0xf0] }
  0x19   :  { %v723_v13 = vor.u32 %v825_v11, %v722_v10  ;;  %v824_v16 = vld [vmem:[#allocation7 + $0xf4] sm:$0xf]  ;;  %148 = vmatpush.bf16.msra.mxu1 %v597_v7  ;;  %v663_v17 = vor.u32 %v808_v14, %v660_v15  ;;  %v724_v18 = vld [vmem:[#allocation7 + $0xf8] sm:$0xf0]  ;;  %v650_v19 = vld [vmem:[#allocation7 + $0x60] sm:$0xf] }
  0x1a   :  { %v807_v20 = vld [vmem:[#allocation7 + $0x64] sm:$0xf0]  ;;  %356 = vmatpush.bf16.msra.mxu2 %v659_v12  ;;  %v727_v21 = vor.u32 %v824_v16, %v724_v18  ;;  %v714_v23 = vld [vmem:[#allocation7 + $0xe0] sm:$0xf]  ;;  %v806_v25 = vld [vmem:[#allocation7 + $0x64] sm:$0xf] }
  0x1b   :  { %369 = vmatpush.bf16.msra.mxu3 %v723_v13  ;;  %v651_v22 = vor.u32 %v807_v20, %v650_v19  ;;  %v823_v24 = vld [vmem:[#allocation7 + $0xe4] sm:$0xf0]  ;;  %598 = vmatmul.msk.bf16.vlgmr.msra.gmra.mxu0 %vm124_vm0, %v105_v8  ;;  %v652_v27 = vld [vmem:[#allocation7 + $0x68] sm:$0xf0]  ;;  %v822_v28 = vld [vmem:[#allocation7 + $0xe4] sm:$0xf] }
  0x1c   :  { %v715_v26 = vor.u32 %v823_v24, %v714_v23  ;;  %v716_v29 = vld [vmem:[#allocation7 + $0xe8] sm:$0xf0]  ;;  %599 = vmatmul.msk.bf16.vlgmr.msra.gmra.mxu1 %vm124_vm0, %v105_v8  ;;  %382 = vmatpush.bf16.msrb.mxu0 %v663_v17  ;;  %v655_v30 = vor.u32 %v806_v25, %v652_v27  ;;  %v642_v31 = vld [vmem:[#allocation7 + $0x50] sm:$0xf]  ;;  %v805_v32 = vld [vmem:[#allocation7 + $0x54] sm:$0xf0] }
  0x1d   :  { %v706_v33 = vld [vmem:[#allocation7 + $0xd0] sm:$0xf]  ;;  %395 = vmatpush.bf16.msrb.mxu1 %v727_v21  ;;  %v719_v34 = vor.u32 %v822_v28, %v716_v29  ;;  %v821_v35 = vld [vmem:[#allocation7 + $0xd4] sm:$0xf0]  ;;  %v804_v36 = vld [vmem:[#allocation7 + $0x54] sm:$0xf]  ;;  %v643_v38 = vor.u32 %v805_v32, %v642_v31 }
  0x1e   :  { %v644_v37 = vld [vmem:[#allocation7 + $0x58] sm:$0xf0]  ;;  %357 = vmatpush.bf16.msra.mxu2 %v651_v22  ;;  %v707_v39 = vor.u32 %v821_v35, %v706_v33  ;;  %v820_v40 = vld [vmem:[#allocation7 + $0xd4] sm:$0xf]  ;;  %v634_v42 = vld [vmem:[#allocation7 + $0x40] sm:$0xf] }
  0x1f   :  { %370 = vmatpush.bf16.msra.mxu3 %v715_v26  ;;  %v708_v41 = vld [vmem:[#allocation7 + $0xd8] sm:$0xf0]  ;;  %v803_v43 = vld [vmem:[#allocation7 + $0x44] sm:$0xf0]  ;;  %v698_v44 = vld [vmem:[#allocation7 + $0xc0] sm:$0xf]  ;;  %v647_v46 = vor.u32 %v804_v36, %v644_v37 }
  0x20   :  { %v819_v45 = vld [vmem:[#allocation7 + $0xc4] sm:$0xf0]  ;;  %383 = vmatpush.bf16.msrb.mxu0 %v655_v30  ;;  %v711_v47 = vor.u32 %v820_v40, %v708_v41  ;;  %v802_v48 = vld [vmem:[#allocation7 + $0x44] sm:$0xf]  ;;  %v636_v49 = vld [vmem:[#allocation7 + $0x48] sm:$0xf0]  ;;  %v635_v50 = vor.u32 %v803_v43, %v634_v42 }
  0x21   :  { %396 = vmatpush.bf16.msrb.mxu1 %v719_v34  ;;  %v699_v51 = vor.u32 %v819_v45, %v698_v44  ;;  %v818_v52 = vld [vmem:[#allocation7 + $0xc4] sm:$0xf]  ;;  %v700_v53 = vld [vmem:[#allocation7 + $0xc8] sm:$0xf0]  ;;  %v626_v54 = vld [vmem:[#allocation7 + $0x30] sm:$0xf]  ;;  %v639_v58 = vor.u32 %v802_v48, %v636_v49 }
  0x22   :  { %358 = vmatpush.bf16.msra.mxu2 %v643_v38  ;;  %v801_v55 = vld [vmem:[#allocation7 + $0x34] sm:$0xf0]  ;;  %v690_v56 = vld [vmem:[#allocation7 + $0xb0] sm:$0xf]  ;;  %v800_v59 = vld [vmem:[#allocation7 + $0x34] sm:$0xf]  ;;  %v703_v60 = vor.u32 %v818_v52, %v700_v53 }
  0x23   :  { %371 = vmatpush.bf16.msra.mxu3 %v707_v39  ;;  %v817_v57 = vld [vmem:[#allocation7 + $0xb4] sm:$0xf0]  ;;  %v628_v61 = vld [vmem:[#allocation7 + $0x38] sm:$0xf0]  ;;  %v816_v62 = vld [vmem:[#allocation7 + $0xb4] sm:$0xf]  ;;  %v627_v0 = vor.u32 %v801_v55, %v626_v54 }
  0x24   :  { %384 = vmatpush.bf16.msrb.mxu0 %v647_v46  ;;  %v692_v63 = vld [vmem:[#allocation7 + $0xb8] sm:$0xf0]  ;;  %v691_v1 = vor.u32 %v817_v57, %v690_v56  ;;  %v618_v2 = vld [vmem:[#allocation7 + $0x20] sm:$0xf]  ;;  %v799_v3 = vld [vmem:[#allocation7 + $0x24] sm:$0xf0]  ;;  %v631_v6 = vor.u32 %v800_v59, %v628_v61 }
  0x25   :  { %397 = vmatpush.bf16.msrb.mxu1 %v711_v47  ;;  %v682_v4 = vld [vmem:[#allocation7 + $0xa0] sm:$0xf]  ;;  %v815_v5 = vld [vmem:[#allocation7 + $0xa4] sm:$0xf0]  ;;  %v695_v7 = vor.u32 %v816_v62, %v692_v63  ;;  %v798_v8 = vld [vmem:[#allocation7 + $0x24] sm:$0xf]  ;;  %v619_v10 = vor.u32 %v799_v3, %v618_v2 }
  0x26   :  { %359 = vmatpush.bf16.msra.mxu2 %v635_v50  ;;  %v620_v9 = vld [vmem:[#allocation7 + $0x28] sm:$0xf0]  ;;  %v683_v11 = vor.u32 %v815_v5, %v682_v4  ;;  %v814_v12 = vld [vmem:[#allocation7 + $0xa4] sm:$0xf]  ;;  %v610_v16 = vld [vmem:[#allocation7 + $0x10] sm:$0xf] }
  0x27   :  { %372 = vmatpush.bf16.msra.mxu3 %v699_v51  ;;  %v684_v13 = vld [vmem:[#allocation7 + $0xa8] sm:$0xf0]  ;;  %v623_v14 = vor.u32 %v798_v8, %v620_v9  ;;  %v797_v17 = vld [vmem:[#allocation7 + $0x14] sm:$0xf0]  ;;  %v674_v18 = vld [vmem:[#allocation7 + $0x90] sm:$0xf] }
  0x28   :  { %385 = vmatpush.bf16.msrb.mxu0 %v639_v58  ;;  %v687_v15 = vor.u32 %v814_v12, %v684_v13  ;;  %v611_v19 = vor.u32 %v797_v17, %v610_v16  ;;  %v813_v20 = vld [vmem:[#allocation7 + $0x94] sm:$0xf0]  ;;  %v796_v21 = vld [vmem:[#allocation7 + $0x14] sm:$0xf]  ;;  %v612_v22 = vld [vmem:[#allocation7 + $0x18] sm:$0xf0] }
  0x29   :  { %398 = vmatpush.bf16.msrb.mxu1 %v703_v60  ;;  %v675_v23 = vor.u32 %v813_v20, %v674_v18  ;;  %v615_v24 = vor.u32 %v796_v21, %v612_v22  ;;  %v812_v25 = vld [vmem:[#allocation7 + $0x94] sm:$0xf]  ;;  %v676_v26 = vld [vmem:[#allocation7 + $0x98] sm:$0xf0]  ;;  %v602_v28 = vld [vmem:[#allocation7] sm:$0xf] }
  0x2a   :  { %360 = vmatpush.bf16.msra.mxu2 %v627_v0  ;;  %v679_v27 = vor.u32 %v812_v25, %v676_v26  ;;  %v795_v29 = vld [vmem:[#allocation7 + $0x4] sm:$0xf0]  ;;  %v666_v30 = vld [vmem:[#allocation7 + $0x80] sm:$0xf]  ;;  %v794_v33 = vld [vmem:[#allocation7 + $0x4] sm:$0xf] }
  0x2b   :  { %373 = vmatpush.bf16.msra.mxu3 %v691_v1  ;;  %v603_v31 = vor.u32 %v795_v29, %v602_v28  ;;  %v811_v32 = vld [vmem:[#allocation7 + $0x84] sm:$0xf0]  ;;  %v604_v34 = vld [vmem:[#allocation7 + $0x8] sm:$0xf0]  ;;  %v810_v37 = vld [vmem:[#allocation7 + $0x84] sm:$0xf] }
  0x2c   :  { %386 = vmatpush.bf16.msrb.mxu0 %v631_v6  ;;  %v667_v35 = vor.u32 %v811_v32, %v666_v30  ;;  %v607_v36 = vor.u32 %v794_v33, %v604_v34  ;;  %v668_v38 = vld [vmem:[#allocation7 + $0x88] sm:$0xf0]  ;;  %v841_v40 = vld [vmem:[#allocation9 + $0x78] sm:$0xff]  ;;  %v840_v42 = vld [vmem:[#allocation9 + $0x70] sm:$0xff]  ;;  %v571_v30 = vlaneseq  ;;  %vm581_vm2 = vcmask 64512  }
  0x2d   :  { %399 = vmatpush.bf16.msrb.mxu1 %v695_v7  ;;  %v671_v39 = vor.u32 %v810_v37, %v668_v38  ;;  %v833_v41 = vld [vmem:[#allocation9 + $0x38] sm:$0xff]  ;;  %v832_v43 = vld [vmem:[#allocation9 + $0x30] sm:$0xff]  ;;  %v839_v44 = vld [vmem:[#allocation9 + $0x68] sm:$0xff] }
  0x2e   :  { %361 = vmatpush.bf16.msra.mxu2 %v619_v10  ;;  %v831_v45 = vld [vmem:[#allocation9 + $0x28] sm:$0xff]  ;;  %v838_v46 = vld [vmem:[#allocation9 + $0x60] sm:$0xff]  ;;  %v837_v48 = vld [vmem:[#allocation9 + $0x58] sm:$0xff] }
  0x2f   :  { %374 = vmatpush.bf16.msra.mxu3 %v683_v11  ;;  %v830_v47 = vld [vmem:[#allocation9 + $0x20] sm:$0xff]  ;;  %v108_v49 = vld [vmem:[#allocation6] sm:$0x3]  ;;  %v836_v50 = vld [vmem:[#allocation9 + $0x50] sm:$0xff] }
  0x30   :  { %387 = vmatpush.bf16.msrb.mxu0 %v623_v14  ;;  %v110_v51 = vperm.slane %v108_v49, 0  ;;  %v111_v52 = vperm.slane %v108_v49, 1  ;;  %v829_v63 = vld [vmem:[#allocation9 + $0x18] sm:$0xff]  ;;  %v835_v0 = vld [vmem:[#allocation9 + $0x48] sm:$0xff]  ;;  %v828_v1 = vld [vmem:[#allocation9 + $0x10] sm:$0xff] }
  0x31   :  { %400 = vmatpush.bf16.msrb.mxu1 %v687_v15  ;;  %v834_v2 = vld [vmem:[#allocation9 + $0x40] sm:$0xff]  ;;  %v827_v3 = vld [vmem:[#allocation9 + $0x8] sm:$0xff] }
  0x32   :  { %362 = vmatpush.bf16.msra.mxu2 %v611_v19  ;;  %v826_v4 = vld [vmem:[#allocation9] sm:$0xff] }
  0x33   :  { %375 = vmatpush.bf16.msra.mxu3 %v675_v23  ;;  %v190_v5 = vld [vmem:[%s1068_s4] sm:$0x3] }
  0x34   :  { %388 = vmatpush.bf16.msrb.mxu0 %v615_v24  ;;  %v193_v6 = vperm.slane %v190_v5, 1  ;;  %v192_v11 = vperm.slane %v190_v5, 0  ;;  %v851_v25 = vld [vmem:[%s1070_s6] ss:$0 sm:$0xff] }
  0x35   :  { %401 = vmatpush.bf16.msrb.mxu1 %v679_v27  ;;  %v852_v32 = vld [vmem:[%s1071_s7] ss:$0 sm:$0xff] }
  0x36   :  { %363 = vmatpush.bf16.msra.mxu2 %v603_v31  ;;  %v572_v31 = vand.u32 127, %v571_v30 }
  0x37   :  { %376 = vmatpush.bf16.msra.mxu3 %v667_v35 }
  0x38   :  { %389 = vmatpush.bf16.msrb.mxu0 %v607_v36  ;;  %vm573_vm1 = vcmp.lt.s32.totalorder %v572_v31, 2 }
  0x39   :  { %402 = vmatpush.bf16.msrb.mxu1 %v671_v39 }
  0x3a   :  { %540 = vmatpush.bf16.msrb.mxu2 %v833_v41 }
  0x3b   :  { %553 = vmatpush.bf16.msrb.mxu3 %v841_v40 }
  0x3e   :  { %541 = vmatpush.bf16.msrb.mxu2 %v832_v43 }
  0x3f   :  { %554 = vmatpush.bf16.msrb.mxu3 %v840_v42 }
  0x42   :  { %542 = vmatpush.bf16.msrb.mxu2 %v831_v45 }
  0x43   :  { %555 = vmatpush.bf16.msrb.mxu3 %v839_v44 }
  0x46   :  { %543 = vmatpush.bf16.msrb.mxu2 %v830_v47 }
  0x47   :  { %556 = vmatpush.bf16.msrb.mxu3 %v838_v46 }
  0x4a   :  { %544 = vmatpush.bf16.msrb.mxu2 %v829_v63 }
  0x4b   :  { %557 = vmatpush.bf16.msrb.mxu3 %v837_v48 }
  0x4e   :  { %545 = vmatpush.bf16.msrb.mxu2 %v828_v1 }
  0x4f   :  { %558 = vmatpush.bf16.msrb.mxu3 %v836_v50 }
  0x52   :  { %546 = vmatpush.bf16.msrb.mxu2 %v827_v3 }
  0x53   :  { %559 = vmatpush.bf16.msrb.mxu3 %v835_v0 }
  0x56   :  { %547 = vmatpush.bf16.msrb.mxu2 %v826_v4 }
  0x57   :  { %560 = vmatpush.bf16.msrb.mxu3 %v834_v2 }
  0x98   :  { %v137_v53 = vpop.f32.mrf.mxu0 }
  0x99   :  { %v138_v54 = vadd.f32 %v137_v53, %v110_v51  ;;  %v150_v55 = vpop.f32.mrf.mxu1 }
  0x9a   :  { %v151_v56 = vadd.f32 %v150_v55, %v111_v52 }
  0x9b   :  { %v154_v57 = vmax.f32 %v138_v54, 0.0 }
  0x9c   :  { %v155_v58 = vmax.f32 %v151_v56, 0.0 }
  0x9d   :  { %v156_v59 = vpack.c.bf16 %v154_v57, %v154_v57 }
  0x9e   :  { %v157_v60 = vpack.c.bf16 %v155_v58, %v155_v58 }
  0x9f   :  { %364 = vmatmul.bf16.vlgmr.msra.gmra.mxu2 %v156_v59  ;;  %390 = vmatmul.bf16.vlgmr.msrb.gmra.mxu0 %v156_v59 }
  0xa0   :  { %377 = vmatmul.bf16.vlgmr.msra.gmra.mxu3 %v157_v60  ;;  %403 = vmatmul.bf16.vlgmr.msrb.gmra.mxu1 %v157_v60  ;;  %v139_v61 = vpop.f32.mrf.mxu0 }
  0xa1   :  { %v152_v62 = vpop.f32.mrf.mxu1 }
 0x11c   :  { %v391_v7 = vpop.f32.mrf.mxu0 }
 0x11d   :  { %v392_v8 = vadd.f32 %v391_v7, %v193_v6  ;;  %v404_v9 = vpop.f32.mrf.mxu1 }
 0x11f   :  { %v405_v10 = vadd.f32 %v404_v9, %v392_v8 }
 0x121   :  { %v409_v12 = vmax.f32 %v405_v10, 0.0 }
 0x122   :  { %v365_v13 = vpop.f32.mrf.mxu2 }
 0x123   :  { %v411_v14 = vpack.c.bf16 %v409_v12, %v409_v12  ;;  %v366_v15 = vadd.f32 %v365_v13, %v192_v11  ;;  %v378_v16 = vpop.f32.mrf.mxu3 }
 0x124   :  { %v393_v17 = vpop.f32.mrf.mxu0 }
 0x125   :  { %v379_v18 = vadd.f32 %v378_v16, %v366_v15  ;;  %v406_v19 = vpop.f32.mrf.mxu1  ;;  %561 = vmatmul.bf16.vlgmr.msrb.gmra.mxu3 %v411_v14 }
 0x127   :  { %v408_v20 = vmax.f32 %v379_v18, 0.0 }
 0x129   :  { %v410_v21 = vpack.c.bf16 %v408_v20, %v408_v20 }
 0x12a   :  { %v367_v22 = vpop.f32.mrf.mxu2 }
 0x12b   :  { %v380_v23 = vpop.f32.mrf.mxu3  ;;  %548 = vmatmul.bf16.vlgmr.msrb.gmra.mxu2 %v410_v21 }
 0x1a8   :  { %v562_v24 = vpop.f32.mrf.mxu3 }
 0x1ae   :  { %v549_v26 = vpop.f32.mrf.mxu2 }
 0x1af   :  { %v563_v27 = vadd.f32 %v562_v24, %v549_v26 }
 0x1b0   :  { %v564_v28 = vpop.f32.mrf.mxu3 }
 0x1b1   :  { %v570_v29 = vadd.f32 %v851_v25, %v563_v27 }
 0x1b3   :  { %853 = vtanh.f32 %v570_v29 }
 0x1b6   :  { %v551_v33 = vpop.f32.mrf.mxu2 }
 0x1b9   :  { %v854_v34 = vpop.eup %853 }
 0x1ba   :  { %v579_v35 = vmul.f32 %v854_v34, %v852_v32 }
 0x1bc   :  { %v580_v36 = vsel %vm573_vm1, %v579_v35, %v570_v29 }
 0x1bd   :  { %582 = vst.msk [vmem:[%s1072_s8] sm:$0xff] %vm581_vm2, %v580_v36 }
 0x1be   :  { %587 = vsyncpa [#allocation3], 1 }
 0x1bf   :  { %588 = vsyncpa [#allocation5], 1 }
 0x1c0   :  { %589 = vsyncpa [#allocation8], 1 }

</bundles_post_ra>
